<compile_context>
chip_gen: v7x
topology: tpu7x:2x2x1
jax: 0.10.0
libtpu: 0.0.40
codegen_flags: <defaults>
</compile_context>

<pallas_src>
import functools

import jax
import jax.numpy as jnp
from jax.experimental import pallas as pl
from jax.experimental.pallas import tpu as pltpu

LANES = 128


def _lane_bcast(x, n):
    """Broadcast a (rows, LANES) lane-replicated array to (rows, n) lanes."""
    rows, lanes = x.shape
    if n == lanes:
        return x
    if n % lanes == 0:
        return jnp.tile(x, (1, n // lanes))          # lane replication
    if n < lanes:
        return x[:, :n]                              # small-tile tail case
    return jnp.broadcast_to(x[:, :1], (rows, n))


def _flash_attn_kernel(q_ref, k_ref, v_ref, o_ref, q_sc, m_sc, l_sc, acc_sc,
                       *, scale):
    kv = pl.program_id(2)

    @pl.when(kv == 0)
    def _init():
        # The Q block is resident across the kv axis (its block index does not
        # change), so fold 1/sqrt(D) in (and cast to the MXU dtype) only once
        # per (b, qi) tile instead of once per kv step.
        q_sc[...] = (q_ref[...].astype(jnp.float32) * scale).astype(q_sc.dtype)
        m_sc[...] = jnp.full_like(m_sc, -jnp.inf)
        l_sc[...] = jnp.zeros_like(l_sc)
        acc_sc[...] = jnp.zeros_like(acc_sc)

    q = q_sc[...]                                    # (tq, D)  pre-scaled
    k = k_ref[...]                                   # (tk, D)
    v = v_ref[...]                                   # (tk, d_pad)

    # scores = Q K^T, contracting on D; no explicit transposed copy of K.
    s = jax.lax.dot_general(
        q, k, (((1,), (1,)), ((), ())),
        preferred_element_type=jnp.float32)          # (tq, tk), f32 accumulation

    # Online (flash) softmax update with lane-replicated running stats.
    m_prev = m_sc[...]                               # (tq, 128)
    m_next = jnp.maximum(m_prev, jnp.max(s, axis=-1, keepdims=True))
    alpha = jnp.exp(m_prev - m_next)                 # (tq, 128)
    p = jnp.exp(s - _lane_bcast(m_next, s.shape[-1]))  # (tq, tk)

    l_sc[...] = alpha * l_sc[...] + jax.lax.broadcast_in_dim(
        jnp.sum(p, axis=-1), l_sc.shape, (0,))
    acc_sc[...] = (_lane_bcast(alpha, acc_sc.shape[-1]) * acc_sc[...]
                   + jnp.dot(p.astype(v.dtype), v,
                             preferred_element_type=jnp.float32))
    m_sc[...] = m_next

    @pl.when(kv == pl.num_programs(2) - 1)
    def _finalize():
        # Normalize the (tq, d_pad) accumulator once; approx reciprocal -> EUP.
        # TODO(synk): guard l == 0 (jnp.where) if sequence masking is added.
        inv_l = pl.reciprocal(l_sc[...], approx=True)
        o_ref[...] = (acc_sc[...] *
                      _lane_bcast(inv_l, acc_sc.shape[-1])).astype(o_ref.dtype)


def _is_128_mxu_chip():
    """True for TPU generations with a 128x128-shaped MXU (v5e and older)."""
    try:
        kind = jax.devices()[0].device_kind.lower()
    except Exception:
        return False
    return any(tag in kind for tag in ("v2", "v3", "v4", "v5"))


def _pick_tile(s, preferred):
    for t in (preferred, 256, 128):
        if t <= s and s % t == 0:
            return t
    return s


def base_attention(q, k, v, *, tq=None, tk=None, mxu_dtype=jnp.bfloat16):
    """softmax(Q K^T / sqrt(D)) V as a tiled flash-attention Pallas TPU kernel.

    q, k, v: (B, S, D) arrays (same shape/dtype). Returns (B, S, D) in the
    input dtype (accumulation is always f32).
    tq / tk: query / key tile sizes (defaults match the local chip's MXU).
    mxu_dtype: matmul-input dtype.  Defaults to bfloat16 (native MXU input on
               v5e/v6e/v7x, halves re-streamed K/V HBM bytes for f32 callers);
               pass None to keep the input dtype for f32-exact scores.
    """
    B, S, D = q.shape
    assert k.shape == (B, S, D) and v.shape == (B, S, D)
    out_dtype = q.dtype
    scale = 1.0 / (D ** 0.5)                 # scale uses the ORIGINAL head dim

    # Cast once in the wrapper (not per kv step in the kernel): K/V are re-read
    # from HBM once per query tile, so bf16 halves that traffic for f32 inputs.
    if mxu_dtype is not None and q.dtype != mxu_dtype:
        q = q.astype(mxu_dtype)
        k = k.astype(mxu_dtype)
        v = v.astype(mxu_dtype)

    # Lane-dense output: pad ONLY V (and the output) up to a multiple of 128.
    # Q/K keep the original head dim (full-extent last block dim is legal), so
    # small D does not inflate Q/K HBM reads or the QK^T contraction.
    d_pad = ((D + LANES - 1) // LANES) * LANES
    if d_pad != D:
        v = jnp.pad(v, ((0, 0), (0, 0), (0, d_pad - D)))

    # Tile sizes: 256 matches the v6e/v7x 2x256^2 MXU; v5e (4x128^2, lowest HBM
    # bandwidth) keeps tk=128 but still benefits from tq=256 on long sequences.
    if tq is None:
        tq = _pick_tile(S, 256)
    if tk is None:
        tk = _pick_tile(S, 128 if _is_128_mxu_chip() else 256)
    assert S % tq == 0 and S % tk == 0, "S must be divisible by the tile sizes"
    # TODO(synk): pad + mask the sequence axis for S not divisible by the tiles.

    nq, nk = S // tq, S // tk
    if B == 1 and nq > 1:
        # Keep both v7x TensorCores busy: lead with the query-tile axis when
        # the batch axis is degenerate.
        grid = (nq, B, nk)
        b_ax, q_ax = 1, 0
    else:
        grid = (B, nq, nk)
        b_ax, q_ax = 0, 1

    def _q_map(*g):
        return (g[b_ax], g[q_ax], 0)

    def _kv_map(*g):
        return (g[b_ax], g[2], 0)

    q_spec = pl.BlockSpec((None, tq, D), _q_map)
    k_spec = pl.BlockSpec((None, tk, D), _kv_map)
    v_spec = pl.BlockSpec((None, tk, d_pad), _kv_map)
    o_spec = pl.BlockSpec((None, tq, d_pad), _q_map)

    kernel = functools.partial(_flash_attn_kernel, scale=scale)

    out = pl.pallas_call(
        kernel,
        out_shape=jax.ShapeDtypeStruct((B, S, d_pad), out_dtype),
        grid_spec=pltpu.PrefetchScalarGridSpec(
            num_scalar_prefetch=0,
            grid=grid,
            in_specs=[q_spec, k_spec, v_spec],
            out_specs=o_spec,
            scratch_shapes=[
                pltpu.VMEM((tq, D), q.dtype),           # pre-scaled Q tile
                pltpu.VMEM((tq, LANES), jnp.float32),   # running max (lane-replicated)
                pltpu.VMEM((tq, LANES), jnp.float32),   # running sum (lane-replicated)
                pltpu.VMEM((tq, d_pad), jnp.float32),   # output accumulator
            ],
        ),
        compiler_params=pltpu.CompilerParams(
            dimension_semantics=("parallel", "parallel", "arbitrary"),
        ),
    )(q, k, v)

    if d_pad != D:
        out = out[..., :D]
    return out


def _reference_attention(q, k, v):
    d = q.shape[-1]
    scores = jnp.einsum("bsd,btd->bst", q.astype(jnp.float32),
                        k.astype(jnp.float32)) / (d ** 0.5)
    p = jax.nn.softmax(scores, axis=-1)
    return jnp.einsum("bst,btd->bsd", p, v.astype(jnp.float32)).astype(q.dtype)


if __name__ == "__main__":
    # Case 1: the module-implied small shape (B=2, S=8, D=32).  Only V / the
    # output are padded to 128 lanes; Q/K stay at D=32.
    kq, kk, kv_ = jax.random.split(jax.random.PRNGKey(0), 3)
    B, S, D = 2, 8, 32
    q = jax.random.normal(kq, (B, S, D), dtype=jnp.float32)
    k = jax.random.normal(kk, (B, S, D), dtype=jnp.float32)
    v = jax.random.normal(kv_, (B, S, D), dtype=jnp.float32)

    out = base_attention(q, k, v)
    jax.block_until_ready(out)
    ref = _reference_attention(q, k, v)
    assert out.shape == (B, S, D)
    assert jnp.allclose(out, ref, atol=2e-2, rtol=2e-2)   # bf16 MXU inputs

    # Case 2: long sequence — exercises online-softmax accumulation across
    # multiple KV tiles with the default (MXU-matched) tile sizes.
    kq2, kk2, kv2 = jax.random.split(jax.random.PRNGKey(1), 3)
    B2, S2, D2 = 2, 512, 128
    q2 = jax.random.normal(kq2, (B2, S2, D2), dtype=jnp.float32)
    k2 = jax.random.normal(kk2, (B2, S2, D2), dtype=jnp.float32)
    v2 = jax.random.normal(kv2, (B2, S2, D2), dtype=jnp.float32)

    out2 = base_attention(q2, k2, v2)
    jax.block_until_ready(out2)
    ref2 = _reference_attention(q2, k2, v2)
    assert out2.shape == (B2, S2, D2)
    assert jnp.allclose(out2, ref2, atol=2e-2, rtol=2e-2)

    # Case 3: B=1 (query-tile axis leads the grid), f32-exact MXU path,
    # head dim not a multiple of 128 (pad-V-only path), explicit 128 tiles.
    kq3, kk3, kv3 = jax.random.split(jax.random.PRNGKey(2), 3)
    B3, S3, D3 = 1, 256, 64
    q3 = jax.random.normal(kq3, (B3, S3, D3), dtype=jnp.float32)
    k3 = jax.random.normal(kk3, (B3, S3, D3), dtype=jnp.float32)
    v3 = jax.random.normal(kv3, (B3, S3, D3), dtype=jnp.float32)

    out3 = base_attention(q3, k3, v3, tq=128, tk=128, mxu_dtype=None)
    jax.block_until_ready(out3)
    ref3 = _reference_attention(q3, k3, v3)
    assert out3.shape == (B3, S3, D3)
    assert jnp.allclose(out3, ref3, atol=1e-2, rtol=1e-2)

    print("KERNEL_OK")
</pallas_src>

<mosaic_0001>
module attributes {stable_mosaic.version = 11 : i64} {
  func.func @_flash_attn_kernel(%arg0: i32, %arg1: i32, %arg2: i32, %arg3: memref<1x8x32xbf16, #tpu.memory_space<vmem>>, %arg4: memref<1x8x32xbf16, #tpu.memory_space<vmem>>, %arg5: memref<1x8x128xbf16, #tpu.memory_space<vmem>>, %arg6: memref<1x8x128xf32, #tpu.memory_space<vmem>>, %arg7: memref<8x32xbf16, #tpu.memory_space<vmem>>, %arg8: memref<8x128xf32, #tpu.memory_space<vmem>>, %arg9: memref<8x128xf32, #tpu.memory_space<vmem>>, %arg10: memref<8x128xf32, #tpu.memory_space<vmem>>) attributes {dimension_semantics = [#tpu.dimension_semantics<parallel>, #tpu.dimension_semantics<parallel>, #tpu.dimension_semantics<arbitrary>], iteration_bounds = array<i64: 2, 1, 1>, scalar_prefetch = 0 : i64, scratch_operands = 4 : i64, tpu.core_type = #tpu.core_type<tc>, window_params = [{transform_indices = @transform_0, window_bounds = array<i64: 1, 8, 32>}, {transform_indices = @transform_1, window_bounds = array<i64: 1, 8, 32>}, {transform_indices = @transform_2, window_bounds = array<i64: 1, 8, 128>}, {transform_indices = @transform_3, window_bounds = array<i64: 1, 8, 128>}]} {
    %c0_i32 = arith.constant 0 : i32
    %0 = arith.cmpi eq, %arg2, %c0_i32 : i32
    %1 = arith.extui %0 : i1 to i32
    %c0_i32_0 = arith.constant 0 : i32
    %2 = arith.cmpi ne, %1, %c0_i32_0 : i32
    scf.if %2 {
      %c0_25 = arith.constant 0 : index
      %c0_26 = arith.constant 0 : index
      %c0_27 = arith.constant 0 : index
      %36 = vector.load %arg3[%c0_25, %c0_26, %c0_27] : memref<1x8x32xbf16, #tpu.memory_space<vmem>>, vector<1x8x32xbf16>
      %37 = vector.shape_cast %36 : vector<1x8x32xbf16> to vector<8x32xbf16>
      %38 = arith.extf %37 : vector<8x32xbf16> to vector<8x32xf32>
      %cst_28 = arith.constant 0.176776692 : f32
      %39 = vector.broadcast %cst_28 : f32 to vector<8x32xf32>
      %40 = arith.mulf %38, %39 : vector<8x32xf32>
      %41 = arith.truncf %40 : vector<8x32xf32> to vector<8x32xbf16>
      %c0_29 = arith.constant 0 : index
      %c0_30 = arith.constant 0 : index
      %42 = vector.load %arg7[%c0_29, %c0_30] : memref<8x32xbf16, #tpu.memory_space<vmem>>, vector<8x32xbf16>
      tpu.vector_store %arg7[%c0_29, %c0_30], %41 {strides = array<i32>} : memref<8x32xbf16, #tpu.memory_space<vmem>>, vector<8x32xbf16>,
      %cst_31 = arith.constant 0xFF800000 : f32
      %43 = vector.broadcast %cst_31 : f32 to vector<8x128xf32>
      %c0_32 = arith.constant 0 : index
      %c0_33 = arith.constant 0 : index
      %44 = vector.load %arg8[%c0_32, %c0_33] : memref<8x128xf32, #tpu.memory_space<vmem>>, vector<8x128xf32>
      tpu.vector_store %arg8[%c0_32, %c0_33], %43 {strides = array<i32>} : memref<8x128xf32, #tpu.memory_space<vmem>>, vector<8x128xf32>,
      %cst_34 = arith.constant 0.000000e+00 : f32
      %45 = vector.broadcast %cst_34 : f32 to vector<8x128xf32>
      %c0_35 = arith.constant 0 : index
      %c0_36 = arith.constant 0 : index
      %46 = vector.load %arg9[%c0_35, %c0_36] : memref<8x128xf32, #tpu.memory_space<vmem>>, vector<8x128xf32>
      tpu.vector_store %arg9[%c0_35, %c0_36], %45 {strides = array<i32>} : memref<8x128xf32, #tpu.memory_space<vmem>>, vector<8x128xf32>,
      %cst_37 = arith.constant 0.000000e+00 : f32
      %47 = vector.broadcast %cst_37 : f32 to vector<8x128xf32>
      %c0_38 = arith.constant 0 : index
      %c0_39 = arith.constant 0 : index
      %48 = vector.load %arg10[%c0_38, %c0_39] : memref<8x128xf32, #tpu.memory_space<vmem>>, vector<8x128xf32>
      tpu.vector_store %arg10[%c0_38, %c0_39], %47 {strides = array<i32>} : memref<8x128xf32, #tpu.memory_space<vmem>>, vector<8x128xf32>,
    } else {
    }
    %c0 = arith.constant 0 : index
    %c0_1 = arith.constant 0 : index
    %3 = vector.load %arg7[%c0, %c0_1] : memref<8x32xbf16, #tpu.memory_space<vmem>>, vector<8x32xbf16>
    %c0_2 = arith.constant 0 : index
    %c0_3 = arith.constant 0 : index
    %c0_4 = arith.constant 0 : index
    %4 = vector.load %arg4[%c0_2, %c0_3, %c0_4] : memref<1x8x32xbf16, #tpu.memory_space<vmem>>, vector<1x8x32xbf16>
    %5 = vector.shape_cast %4 : vector<1x8x32xbf16> to vector<8x32xbf16>
    %c0_5 = arith.constant 0 : index
    %c0_6 = arith.constant 0 : index
    %c0_7 = arith.constant 0 : index
    %6 = vector.load %arg5[%c0_5, %c0_6, %c0_7] : memref<1x8x128xbf16, #tpu.memory_space<vmem>>, vector<1x8x128xbf16>
    %7 = vector.shape_cast %6 : vector<1x8x128xbf16> to vector<8x128xbf16>
    %cst = arith.constant dense<0.000000e+00> : vector<8x8xf32>
    %8 = tpu.matmul %3, %5, %cst {dimension_numbers = #tpu.dot_dimension_numbers<[1], [1], [0], [0], [0, 0, 1, 0], [], []>} : vector<8x32xbf16>, vector<8x32xbf16>, vector<8x8xf32> -> vector<8x8xf32>
    %c0_8 = arith.constant 0 : index
    %c0_9 = arith.constant 0 : index
    %9 = vector.load %arg8[%c0_8, %c0_9] : memref<8x128xf32, #tpu.memory_space<vmem>>, vector<8x128xf32>
    %cst_10 = arith.constant dense<0xFF800000> : vector<8xf32>
    %10 = vector.multi_reduction <maximumf>, %8, %cst_10 [1] : vector<8x8xf32> to vector<8xf32>
    %11 = vector.shape_cast %10 : vector<8xf32> to vector<8x1xf32>
    %12 = vector.broadcast %11 : vector<8x1xf32> to vector<8x128xf32>
    %13 = arith.maximumf %9, %12 : vector<8x128xf32>
    %14 = arith.subf %9, %13 : vector<8x128xf32>
    %15 = math.exp %14 : vector<8x128xf32>
    %16 = vector.extract_strided_slice %13 {offsets = [0, 0], sizes = [8, 8], strides = [1, 1]} : vector<8x128xf32> to vector<8x8xf32>
    %17 = arith.subf %8, %16 : vector<8x8xf32>
    %18 = math.exp %17 : vector<8x8xf32>
    %c0_11 = arith.constant 0 : index
    %c0_12 = arith.constant 0 : index
    %19 = vector.load %arg9[%c0_11, %c0_12] : memref<8x128xf32, #tpu.memory_space<vmem>>, vector<8x128xf32>
    %20 = arith.mulf %15, %19 : vector<8x128xf32>
    %cst_13 = arith.constant dense<0.000000e+00> : vector<8xf32>
    %21 = vector.multi_reduction <add>, %18, %cst_13 [1] : vector<8x8xf32> to vector<8xf32>
    %22 = vector.shape_cast %21 : vector<8xf32> to vector<8x1xf32>
    %23 = vector.broadcast %22 : vector<8x1xf32> to vector<8x128xf32>
    %24 = arith.addf %20, %23 : vector<8x128xf32>
    %c0_14 = arith.constant 0 : index
    %c0_15 = arith.constant 0 : index
    %25 = vector.load %arg9[%c0_14, %c0_15] : memref<8x128xf32, #tpu.memory_space<vmem>>, vector<8x128xf32>
    tpu.vector_store %arg9[%c0_14, %c0_15], %24 {strides = array<i32>} : memref<8x128xf32, #tpu.memory_space<vmem>>, vector<8x128xf32>,
    %c0_16 = arith.constant 0 : index
    %c0_17 = arith.constant 0 : index
    %26 = vector.load %arg10[%c0_16, %c0_17] : memref<8x128xf32, #tpu.memory_space<vmem>>, vector<8x128xf32>
    %27 = arith.mulf %15, %26 : vector<8x128xf32>
    %28 = arith.truncf %18 : vector<8x8xf32> to vector<8x8xbf16>
    %cst_18 = arith.constant dense<0.000000e+00> : vector<8x128xf32>
    %29 = tpu.matmul %28, %7, %cst_18 {dimension_numbers = #tpu.dot_dimension_numbers<[1], [0], [0], [1], [0, 0, 1, 1], [], []>} : vector<8x8xbf16>, vector<8x128xbf16>, vector<8x128xf32> -> vector<8x128xf32>
    %30 = arith.addf %27, %29 : vector<8x128xf32>
    %c0_19 = arith.constant 0 : index
    %c0_20 = arith.constant 0 : index
    %31 = vector.load %arg10[%c0_19, %c0_20] : memref<8x128xf32, #tpu.memory_space<vmem>>, vector<8x128xf32>
    tpu.vector_store %arg10[%c0_19, %c0_20], %30 {strides = array<i32>} : memref<8x128xf32, #tpu.memory_space<vmem>>, vector<8x128xf32>,
    %c0_21 = arith.constant 0 : index
    %c0_22 = arith.constant 0 : index
    %32 = vector.load %arg8[%c0_21, %c0_22] : memref<8x128xf32, #tpu.memory_space<vmem>>, vector<8x128xf32>
    tpu.vector_store %arg8[%c0_21, %c0_22], %13 {strides = array<i32>} : memref<8x128xf32, #tpu.memory_space<vmem>>, vector<8x128xf32>,
    %c0_i32_23 = arith.constant 0 : i32
    %33 = arith.cmpi eq, %arg2, %c0_i32_23 : i32
    %34 = arith.extui %33 : i1 to i32
    %c0_i32_24 = arith.constant 0 : i32
    %35 = arith.cmpi ne, %34, %c0_i32_24 : i32
    scf.if %35 {
      %c0_25 = arith.constant 0 : index
      %c0_26 = arith.constant 0 : index
      %36 = vector.load %arg9[%c0_25, %c0_26] : memref<8x128xf32, #tpu.memory_space<vmem>>, vector<8x128xf32>
      %37 = tpu.reciprocal %36 {approx = true} : vector<8x128xf32> -> vector<8x128xf32>
      %c0_27 = arith.constant 0 : index
      %c0_28 = arith.constant 0 : index
      %38 = vector.load %arg10[%c0_27, %c0_28] : memref<8x128xf32, #tpu.memory_space<vmem>>, vector<8x128xf32>
      %39 = arith.mulf %38, %37 : vector<8x128xf32>
      %c0_29 = arith.constant 0 : index
      %c0_30 = arith.constant 0 : index
      %c0_31 = arith.constant 0 : index
      %40 = vector.load %arg6[%c0_29, %c0_30, %c0_31] : memref<1x8x128xf32, #tpu.memory_space<vmem>>, vector<1x8x128xf32>
      %41 = vector.shape_cast %40 : vector<1x8x128xf32> to vector<8x128xf32>
      %42 = vector.shape_cast %39 : vector<8x128xf32> to vector<1x8x128xf32>
      tpu.vector_store %arg6[%c0_29, %c0_30, %c0_31], %42 {strides = array<i32>} : memref<1x8x128xf32, #tpu.memory_space<vmem>>, vector<1x8x128xf32>,
    } else {
    }
    return
  }
  func.func @transform_0(%arg0: i32, %arg1: i32, %arg2: i32) -> (i32, i32, i32) {
    %c0_i32 = arith.constant 0 : i32
    %c0_i32_0 = arith.constant 0 : i32
    return %arg0, %arg1, %c0_i32 : i32, i32, i32
  }
  func.func @transform_1(%arg0: i32, %arg1: i32, %arg2: i32) -> (i32, i32, i32) {
    %c0_i32 = arith.constant 0 : i32
    %c0_i32_0 = arith.constant 0 : i32
    return %arg0, %arg2, %c0_i32 : i32, i32, i32
  }
  func.func @transform_2(%arg0: i32, %arg1: i32, %arg2: i32) -> (i32, i32, i32) {
    %c0_i32 = arith.constant 0 : i32
    %c0_i32_0 = arith.constant 0 : i32
    return %arg0, %arg2, %c0_i32 : i32, i32, i32
  }
  func.func @transform_3(%arg0: i32, %arg1: i32, %arg2: i32) -> (i32, i32, i32) {
    %c0_i32 = arith.constant 0 : i32
    %c0_i32_0 = arith.constant 0 : i32
    return %arg0, %arg1, %c0_i32 : i32, i32, i32
  }
}

</mosaic_0001>

<bundles_post_ra>
// kernel: tpu_custom_call.1
= control target key start
LH: loop header
LB: loop body
LE: loop exit
PB: predicated region body
PF: predicated region fallthrough
CT: control target
= control target key end

     0   :  { %s1162_s0 = inlined_call_operand.hbm [shape: bf16[2,8,32], index: 0, kind: input, shape index: {}]   ;;  %s1163_s1 = inlined_call_operand.hbm [shape: bf16[2,8,32], index: 1, kind: input, shape index: {}]   ;;  %s1164_s2 = inlined_call_operand.hbm [shape: bf16[2,8,128], index: 2, kind: input, shape index: {}]   ;;  %s1165_s3 = inlined_call_operand.hbm [shape: f32[2,8,128], index: 3, kind: output, shape index: {}]  }
   0x1   :  { %1171 = sst [smem:[#allocation19_spill]] %s1163_s1 }
   0x2   :  { %8 = vsyncpa [#allocation7], 0 }
   0x3   :  { %10 = vsyncpa [#allocation7 + $0x1], 0 }
   0x4   :  { %11 = vsyncpa [#allocation10], 0 }
   0x5   :  { %13 = vsyncpa [#allocation10 + $0x1], 0 }
   0x6   :  { %14 = vsyncpa [#allocation8], 0 }
   0x7   :  { %16 = vsyncpa [#allocation8 + $0x1], 0  ;;  %s895_s12 = smov 0   ;;  %s897_s13 = smov 0  }
   0x8   :  { %s899_s14 = smov 0   ;;  %s901_s15 = smov 0  }
   0x9   :  { %s903_s16 = smov 0   ;;  %s905_s17 = smov 0  }
   0xa LB: > { %1172 = sst [smem:[#allocation16_spill]] %s863_s16  ;;  %s926_s18 = sadd.s32 4294967295, %s867_s17   ;;  %s867_s17 = sphi %s905_s17, %s22_s17   ;;  %s863_s16 = sphi %s903_s16, %s1193_s16   ;;  %s859_s15 = sphi %s901_s15, %s1192_s15   ;;  %s855_s14 = sphi %s899_s14, %s1196_s14   ;;  %s851_s13 = sphi %s897_s13, %s1195_s13   ;;  %s847_s12 = sphi %s895_s12, %s1194_s12  }
   0xb   : > { %s575_s19 = sadd.s32 4294967294, %s867_s17   ;;  %s41_s20 = sadd.s32 1, %s863_s16 }
   0xc   : > { %s50_s21 = sadd.s32 1, %s855_s14  ;;  %p43_p0 = scmp.ge.s32.totalorder %s41_s20, 2 }
   0xd   : > { %p57_p1 = scmp.ne.s32.totalorder %s855_s14, %s851_s13  ;;  %p58_p2 = scmp.eq.s32.totalorder %s867_s17, 0 }
   0xe   : > { %p63_p3 = scmp.ne.s32.totalorder %s851_s13, %s847_s12  ;;  %s1198_s20 = smov (%p43_p0, %s41_s20), 0 }
   0xf   : > { %1173 = sst [smem:[#allocation17_spill]] %s1198_s20  ;;  %p938_p4 = por %p58_p2, %p57_p1 }
  0x10   : > { %p64_p5 = scmp.eq.s32.totalorder %s926_s18, 0  ;;  %s45_s23 = ssub.s32 %s863_s16, %s1198_s20 }
  0x11   : > { %p145_p6 = scmp.eq.s32.totalorder %s926_s18, 1  ;;  %p48_p7 = scmp.eq.s32.totalorder %s45_s23, 0 }
  0x12   : > { %p946_p8 = por %p64_p5, %p63_p3  ;;  %p151_p10 = scmp.eq.s32.totalorder %s575_s19, 1 }
  0x13   : > { %p950_p9 = por %p145_p6, %p57_p1  ;;  %p633_p13 = scmp.lt.s32.totalorder %s867_s17, 2 }
  0x14   : > { %s1175_s24 = scalar_select %p946_p8, 1, 0 }
  0x15   : > { %s1176_s25 = scalar_select %p950_p9, 1, 0 }
  0x16   : > { %s955_s26 = scalar_select %p48_p7, %s855_s14, %s50_s21  }
  0x17   : > { %p957_p11 = por %p151_p10, %p63_p3  ;;  %s171_s28 = sand.u32 1, %s855_s14  }
  0x18   : > { %1177 = sst [smem:[#allocation18_spill]] %s955_s26  ;;  %s966_s29 = sshll.u32 %s171_s28, 2 }
  0x19   : > { %s1178_s27 = scalar_select %p957_p11, 1, 0 }
  0x1a   : > { %s969_s30 = sshll.u32 %s863_s16, 6  ;;  %p973_p0 = pnand %p633_p13, %p938_p4 }
  0x1b   : > { %s190_s5 = sand.u32 1, %s867_s17   ;;  %s1180_s1 = sld [smem:[#allocation19_spill]] }
  0x1c   : > { %s1179_s4 = scalar_select %p973_p0, 1, 0 }
  0x1d   : > { %s194_s9 = scalar_lea.vmem [#allocation9], %s966_s29  ;;  %s989_s11 = scalar_lea.sflag [#allocation10], %s190_s5 }
  0x1e   : > { %s202_s10 = sshll.u32 %s194_s9, 4  ;;  %p995_p4 = pneg %p973_p0  ;;  %s986_s10 = int_to_ptr.vmem [resolvable:$true] %s202_s10 }
  0x21   : > { %s982_s8 = scalar_lea.hbm %s1180_s1, %s969_s30  ;;  %s696_s6 = scalar_lea.hbm %s1180_s1, 128 }
  0x22   : > { %s691_s19 = scalar_lea.hbm %s982_s8, 64  ;;  %p697_p7 = scmp.lt.u32.totalorder %s982_s8, %s1180_s1 }
  0x23   : > { %p692_p3 = scmp.ne.s32.totalorder %s982_s8, %s691_s19  ;;  %p698_p10 = scmp.lt.u32.totalorder %s696_s6, %s691_s19 }
  0x24   : > { %p700_p12 = scmp.lt.u32.totalorder %s691_s19, %s982_s8 }
  0x25   : > { %p694_p5 = pnand %p995_p4, %p692_p3  ;;  %p699_p13 = por %p698_p10, %p697_p7 }
  0x27   : > { %p695_p6 = pneg %p694_p5  ;;  %p701_p1 = por %p700_p12, %p699_p13 }
  0x29   : > { %p702_p2 = pnand %p701_p1, %p695_p6 }
  0x2b   : > { %705 = shalt.err (!%p702_p2)
}
  0x2c   : > { %s706_s5 = scalar_lea.vmem %s986_s10, 64  ;;  %s869_s22 = smov [#allocation9]  }
  0x2d   : > { %p707_p3 = scmp.ne.s32.totalorder %s986_s10, %s706_s5  ;;  %s711_s23 = sshll.u32 %s869_s22, 4  ;;  %s712_s23 = int_to_ptr.vmem [resolvable:$false] %s711_s23 }
  0x2e   : > { %s713_s7 = scalar_lea.vmem %s712_s23, 128  ;;  %p714_p9 = scmp.lt.s32.totalorder %s986_s10, %s712_s23 }
  0x2f   : > { %p709_p5 = pnand %p707_p3, %p995_p4  ;;  %p715_p8 = scmp.lt.s32.totalorder %s713_s7, %s706_s5 }
  0x31   : > { %p710_p11 = pneg %p709_p5  ;;  %p716_p7 = por %p715_p8, %p714_p9 }
  0x33   : > { %p717_p10 = pnand %p716_p7, %p710_p11 }
  0x35   : > { %720 = shalt.err (!%p717_p10)
}
  0x36   : > { %625 = dma.hbm_to_vmem [thread:$0]  (!%p973_p0), %s982_s8, 64, %s986_s10, %s989_s11  }
  0x37   : > { %p1182_p12 = scmp.lt.s32.totalorder %s867_s17, 3  ;;  %p1183_p1 = scmp.ge.s32.totalorder %s867_s17, 1 }
  0x38   : > { %s1031_s5 = scalar_lea.hbm %s1162_s0, %s969_s30  ;;  %s175_s22 = scalar_lea.vmem [#allocation6], %s966_s29 }
  0x39   : > { %p1023_p2 = pnand %p1183_p1, %p1182_p12  ;;  %s183_s23 = sshll.u32 %s175_s22, 4  ;;  %s1034_s23 = int_to_ptr.vmem [resolvable:$true] %s183_s23 }
  0x3a   : > { %s1040_s7 = scalar_lea.hbm %s1164_s2, %s969_s30  ;;  %s172_s1 = scalar_lea.sflag [#allocation7], %s171_s28 }
  0x3b   : > { %s1184_s19 = scalar_select %p1023_p2, 1, 0 }
  0x3c   : > { %s721_s20 = scalar_lea.hbm %s1031_s5, 64  ;;  %s726_s16 = scalar_lea.hbm %s1162_s0, 128 }
  0x3d   : > { %p722_p8 = scmp.ne.s32.totalorder %s1031_s5, %s721_s20  ;;  %p727_p6 = scmp.lt.u32.totalorder %s1031_s5, %s1162_s0 }
  0x3e   : > { %p728_p13 = scmp.lt.u32.totalorder %s726_s16, %s721_s20  ;;  %p730_p5 = scmp.lt.u32.totalorder %s721_s20, %s1031_s5 }
  0x3f   : > { %p724_p9 = pnand %p722_p8, %p995_p4 }
  0x40   : > { %p729_p3 = por %p728_p13, %p727_p6 }
  0x41   : > { %p725_p11 = pneg %p724_p9 }
  0x42   : > { %p731_p7 = por %p730_p5, %p729_p3 }
  0x44   : > { %p732_p10 = pnand %p731_p7, %p725_p11 }
  0x46   : > { %735 = shalt.err (!%p732_p10)
}
  0x47   : > { %s736_s28 = scalar_lea.vmem %s1034_s23, 64  ;;  %s870_s30 = smov [#allocation6]  }
  0x48   : > { %p737_p12 = scmp.ne.s32.totalorder %s1034_s23, %s736_s28  ;;  %s741_s8 = sshll.u32 %s870_s30, 4  ;;  %s742_s8 = int_to_ptr.vmem [resolvable:$false] %s741_s8 }
  0x49   : > { %s743_s26 = scalar_lea.vmem %s742_s8, 128  ;;  %p744_p9 = scmp.lt.s32.totalorder %s1034_s23, %s742_s8 }
  0x4a   : > { %p739_p1 = pnand %p737_p12, %p995_p4  ;;  %p745_p2 = scmp.lt.s32.totalorder %s743_s26, %s736_s28 }
  0x4c   : > { %p740_p8 = pneg %p739_p1  ;;  %p746_p6 = por %p745_p2, %p744_p9 }
  0x4e   : > { %p747_p13 = pnand %p746_p6, %p740_p8 }
  0x50   : > { %750 = shalt.err (!%p747_p13)
}
  0x51   : > { %622 = dma.hbm_to_vmem [thread:$0]  (!%p973_p0), %s1031_s5, 64, %s1034_s23, %s172_s1  }
  0x52   : > { %s213_s16 = scalar_lea.vmem [#allocation11], %s966_s29  ;;  %s751_s10 = scalar_lea.hbm %s1040_s7, 64 }
  0x53   : > { %s221_s20 = sshll.u32 %s213_s16, 4  ;;  %p752_p11 = scmp.ne.s32.totalorder %s1040_s7, %s751_s10  ;;  %s222_s20 = int_to_ptr.vmem [resolvable:$true] %s221_s20 }
  0x54   : > { %s756_s22 = scalar_lea.hbm %s1164_s2, 128  ;;  %p757_p5 = scmp.lt.u32.totalorder %s1040_s7, %s1164_s2 }
  0x55   : > { %p754_p2 = pnand %p752_p11, %p995_p4  ;;  %p758_p7 = scmp.lt.u32.totalorder %s756_s22, %s751_s10 }
  0x56   : > { %p760_p12 = scmp.lt.u32.totalorder %s751_s10, %s1040_s7 }
  0x57   : > { %p755_p3 = pneg %p754_p2  ;;  %p759_p10 = por %p758_p7, %p757_p5 }
  0x59   : > { %p761_p1 = por %p760_p12, %p759_p10 }
  0x5b   : > { %p762_p8 = pnand %p761_p1, %p755_p3 }
  0x5d   : > { %765 = shalt.err (!%p762_p8)
}
  0x5e   : > { %s766_s1 = scalar_lea.vmem %s222_s20, 64  ;;  %s871_s29 = smov [#allocation11]  }
  0x5f   : > { %p767_p9 = scmp.ne.s32.totalorder %s222_s20, %s766_s1  ;;  %s771_s5 = sshll.u32 %s871_s29, 4  ;;  %s772_s5 = int_to_ptr.vmem [resolvable:$false] %s771_s5 }
  0x60   : > { %s773_s23 = scalar_lea.vmem %s772_s5, 128  ;;  %p774_p11 = scmp.lt.s32.totalorder %s222_s20, %s772_s5 }
  0x61   : > { %p769_p6 = pnand %p767_p9, %p995_p4  ;;  %p775_p2 = scmp.lt.s32.totalorder %s773_s23, %s766_s1 }
  0x63   : > { %p770_p13 = pneg %p769_p6  ;;  %p776_p0 = por %p775_p2, %p774_p11 }
  0x65   : > { %p777_p5 = pnand %p776_p0, %p770_p13 }
  0x67   : > { %780 = shalt.err (!%p777_p5)
}
  0x68   : > { %p1185_p7 = scmp.ne.s32.totalorder %s1179_s4, 0  ;;  %p1186_p3 = scmp.ne.s32.totalorder %s1184_s19, 0 }
  0x69   : > { %s1087_s21 = sand.u32 (!%p1186_p3), 1, %s851_s13   ;;  %p1187_p0 = scmp.ne.s32.totalorder (!%p1186_p3), %s1175_s24, 0 }
  0x6a   : > { %628 = dma.hbm_to_vmem [thread:$0]  (!%p1185_p7), %s1040_s7, 64, %s222_s20, %s989_s11  }
  0x6b   : > { %230 = sbr.rel (%p1186_p3) target bundleno = 735 (0x2df), region = 32  ;;  %s1090_s8 = sshll.u32 (!%p1186_p3), %s1087_s21, 2 }
  0x6c   : > { %s233_s26 = scalar_lea.sflag (!%p1186_p3), [#allocation7], %s1087_s21  ;;  %s236_s16 = scalar_lea.vmem (!%p1186_p3), [#allocation6], %s1090_s8 }
  0x72   : > { %834 = dma.done.wait (%p1187_p0), %s233_s26, 64  }
  0x73   : > { %836 = vsyncadd (%p1187_p0), %s233_s26, 4294967232  ;;  %s241_s4 = sand.u32 1, %s926_s18   ;;  %s245_s19 = scalar_lea.vmem [#allocation9], %s1090_s8 }
  0x74   : > { %s242_s11 = scalar_lea.sflag [#allocation10], %s241_s4 }
  0x75   : > { %838 = dma.done.wait (%p1187_p0), %s242_s11, 128  }
  0x76   : > { %840 = vsyncadd (%p1187_p0), %s242_s11, 4294967168  ;;  %v872_v0 = vmov 0.0   ;;  %vm873_vm0 = vmmov 0   ;;  %vm304_vm1 = vcmask 261120   ;;  %v292_v1 = vld [vmem:[%s236_s16] sm:$0xf] }
  0x77   : > { %599 = vmatprep.subr.bf16.mxu0 %v872_v0  ;;  %601 = vmatprep.mubr.msk.bf16.mxu0 %vm873_vm0, %v872_v0  ;;  %v302_v2 = vld [vmem:[%s245_s19] sm:$0xf]  ;;  %v293_v3 = vunpack.c.l.bf16 %v292_v1  ;;  %vm296_vm2 = vcmask 257024   ;;  %vm352_vm3 = vcmask 64512   ;;  %vm376_vm4 = vcmask 1043456   ;;  %s254_s18 = scalar_lea.vmem [#allocation11], %s1090_s8 }
  0x78   : > { %605 = vmatprep.subr.bf16.mxu1 %v872_v0  ;;  %607 = vmatprep.mubr.msk.bf16.mxu1 %vm873_vm0, %v872_v0  ;;  %v309_v4 = vsel %vm304_vm1, %v302_v2, 0  ;;  %v303_v13 = vld [vmem:[%s254_s18] sm:$0xf]  ;;  %s588_s24 = sshll.u32 %s1087_s21, 3  ;;  %s592_s7 = sshll.u32 %s859_s15, 7 }
  0x79   : > { %600 = vmatpush3.bf16.xpose.msra.mxu0 %v309_v4  ;;  %v294_v5 = vmul.f32 0.17677669, %v293_v3  ;;  %v378_v14 = vsel %vm376_vm4, %v303_v13, 0  ;;  %s286_s20 = scalar_lea.vmem [#allocation12], %s588_s24  ;;  %s1113_s22 = scalar_lea.hbm %s1165_s3, %s592_s7 }
  0x7a   : > { %606 = vmatpush3.bf16.msra.mxu1 %v378_v14  ;;  %s446_s10 = sshll.u32 %s286_s20, 4  ;;  %s432_s15 = scalar_lea.sflag [#allocation8], %s1087_s21  ;;  %s1115_s10 = int_to_ptr.vmem [resolvable:$true] %s446_s10 }
  0x7b   : > { %v295_v6 = vpack.c.bf16 %v294_v5, %v294_v5  ;;  %s781_s28 = scalar_lea.vmem %s1115_s10, 128  ;;  %p1188_p10 = scmp.ne.s32.totalorder %s1176_s25, 0 }
  0x7c   : > { %p782_p4 = scmp.ne.s32.totalorder %s1115_s10, %s781_s28  ;;  %s874_s30 = smov [#allocation12]  }
  0x7d   : > { %297 = vst.msk [vmem:[#allocation2] sm:$0xf] %vm296_vm2, %v295_v6  ;;  %s785_s1 = sshll.u32 %s874_s30, 4  ;;  %s786_s1 = int_to_ptr.vmem [resolvable:$false] %s785_s1 }
  0x7e   : > { %p783_p12 = pnand %p782_p4, %p1188_p10  ;;  %s787_s29 = scalar_lea.vmem %s786_s1, 256 }
  0x7f   : > { %p788_p8 = scmp.lt.s32.totalorder %s1115_s10, %s786_s1  ;;  %p789_p9 = scmp.lt.s32.totalorder %s787_s29, %s781_s28 }
  0x80   : > { %p784_p1 = pneg %p783_p12 }
  0x81   : > { %p790_p6 = por %p789_p9, %p788_p8 }
  0x83   : > { %p791_p13 = pnand %p790_p6, %p784_p1 }
  0x84   : > { %v301_v7 = vld [vmem:[#allocation2] sm:$0xf] }
  0x85   : > { %602 = vmatmul.mubr.msk.bf16.vlgmr.msra.gmra.mrb[0].mxu0 %vm304_vm1, %v301_v7 }
 0x158   : > { %v345_v8 = vpop.f32.mrb[0].mxu0 }
 0x159   : > { %v603_v9 = vpop.f32.mrb[1].mxu0  ;;  %v353_v10 = vsel %vm352_vm3, %v345_v8, -inf }
 0x15a   : > { %354 = vmax.xlane.f32.xlu0 %v353_v10  ;;  %v348_v11 = vpop.f32.mrb[2].mxu0 }
 0x15b   : > { %v604_v12 = vpop.f32.mrb[3].mxu0 }
 0x1e7   : > { %v355_v15 = vpop.xlane.xlu0 %354 }
 0x1e8   : > { %v360_v16 = vsub.f32 %v345_v8, %v355_v15  ;;  %v357_v21 = vsub.f32 -inf, %v355_v15 }
 0x1ea   : > { %v361_v17 = vmul.f32 1.442695, %v360_v16  ;;  %v358_v22 = vmul.f32 1.442695, %v357_v21 }
 0x1ec   : > { %685 = vpow2.f32 %v361_v17 }
 0x1ed   : > { %687 = vpow2.f32 %v358_v22 }
 0x1f6   : > { %v686_v18 = vpop.eup %685 }
 0x1f7   : > { %v365_v19 = vsel %vm352_vm3, %v686_v18, 0.0  ;;  %v372_v20 = vpack.c.bf16 %v686_v18, %v686_v18  ;;  %v688_v23 = vpop.eup %687 }
 0x1f8   : > { %366 = vadd.xlane.f32.xlu0 %v365_v19  ;;  %v364_v25 = vmul.f32 0.0, %v688_v23 }
 0x1f9   : > { %608 = vmatmul.mubr.msk.bf16.vlgmr.msra.gmra.mrb[0].mxu1 %vm352_vm3, %v372_v20 }
 0x285   : > { %v367_v24 = vpop.xlane.xlu0 %366 }
 0x286   : > { %v368_v26 = vadd.f32 %v367_v24, %v364_v25 }
 0x288   : > { %689 = vrcp.f32 %v368_v26 }
 0x292   : > { %v690_v30 = vpop.eup %689 }
 0x2cc   : > { %v414_v27 = vpop.f32.mrb[0].mxu1 }
 0x2cd   : > { %v420_v28 = vadd.f32 %v414_v27, %v364_v25  ;;  %v609_v29 = vpop.f32.mrb[1].mxu1 }
 0x2ce   : > { %v417_v31 = vpop.f32.mrb[2].mxu1 }
 0x2cf   : > { %v429_v32 = vmul.f32 %v690_v30, %v420_v28  ;;  %v610_v33 = vpop.f32.mrb[3].mxu1 }
 0x2d1   : > { %430 = vst [vmem:[%s286_s20] sm:$0xff] %v429_v32 }
 0x2d2   : > { %794 = shalt.err (!%p791_p13)
}
 0x2d3   : > { %s795_s5 = scalar_lea.hbm %s1113_s22, 128  ;;  %s799_s8 = scalar_lea.hbm %s1165_s3, 256 }
 0x2d4   : > { %p796_p11 = scmp.ne.s32.totalorder %s1113_s22, %s795_s5  ;;  %p800_p7 = scmp.lt.u32.totalorder %s1113_s22, %s1165_s3 }
 0x2d5   : > { %p801_p3 = scmp.lt.u32.totalorder %s799_s8, %s795_s5  ;;  %p803_p4 = scmp.lt.u32.totalorder %s795_s5, %s1113_s22 }
 0x2d6   : > { %p797_p2 = pnand %p796_p11, %p1188_p10 }
 0x2d7   : > { %p802_p0 = por %p801_p3, %p800_p7 }
 0x2d8   : > { %p798_p5 = pneg %p797_p2 }
 0x2d9   : > { %p804_p12 = por %p803_p4, %p802_p0 }
 0x2db   : > { %p805_p1 = pnand %p804_p12, %p798_p5 }
 0x2dd   : > { %808 = shalt.err (!%p805_p1)
}
 0x2de   : > { %617 = dma.vmem_to_hbm [thread:$0]  (%p1188_p10), %s1115_s10, 128, %s1113_s22, %s432_s15  }
 0x2df PF: > { %s458_s4 = sand.u32 1, %s847_s12   ;;  %p1189_p8 = scmp.ne.s32.totalorder %s1178_s27, 0 }
 0x2e0   : > { %p1190_p9 = scmp.ge.s32.totalorder %s867_s17, 2  ;;  %s459_s11 = scalar_lea.sflag [#allocation8], %s458_s4 }
 0x2e2   : > { %p630_p6 = pnand %p1190_p9, %p1189_p8 }
 0x2e4   : > { %842 = dma.done.wait (!%p630_p6), %s459_s11, 128  }
 0x2e5   : > { %844 = vsyncadd (!%p630_p6), %s459_s11, 4294967168  ;;  %s22_s17 = sadd.s32 1, %s867_s17   ;;  %s1191_s25 = sld [smem:[#allocation18_spill]] }
 0x2e6   : > { %p19_p13 = scmp.ge.s32.totalorder %s22_s17, 4   ;;  %s1192_s15 = sld [smem:[#allocation16_spill]] }
 0x2e7   : > { %s1193_s16 = sld [smem:[#allocation17_spill]]  ;;  %s1194_s12 = smov %s851_s13 }
 0x2e8   : > { %s1195_s13 = smov %s855_s14  ;;  %21 = sbr.rel (!%p19_p13) target bundleno = 10 (0xa), region = 109 }
 0x2eb   : > { %s1196_s14 = smov %s1191_s25 }
 0x2ef   :  { %464 = vsyncpa [#allocation7], 1 }
 0x2f0   :  { %466 = vsyncpa [#allocation7 + $0x1], 1 }
 0x2f1   :  { %467 = vsyncpa [#allocation10], 1 }
 0x2f2   :  { %469 = vsyncpa [#allocation10 + $0x1], 1 }
 0x2f3   :  { %470 = vsyncpa [#allocation8], 1 }
 0x2f4   :  { %472 = vsyncpa [#allocation8 + $0x1], 1 }

</bundles_post_ra>
